<compile_context>
chip_gen: v6e
topology: v6e:2x2x1
jax: 0.10.0
libtpu: 0.0.40
codegen_flags: <defaults>
</compile_context>

<pallas_src>
import functools

import jax
import jax.numpy as jnp
from jax import lax
from jax.experimental import pallas as pl
from jax.experimental.pallas import tpu as pltpu


# ---------------------------------------------------------------------------
# Sparse scatter path (default): alias embedded_text to the output in HBM and
# DMA only the matched rows.
# ---------------------------------------------------------------------------
def _sparse_kernel(num_placeholders, rows,
                   ph_tok_ref,    # SMEM (P,)     int32  (scalar prefetch)
                   tok_ref,       # SMEM (rows,)  int32  (scalar prefetch)
                   ph_emb_ref,    # VMEM (P, D)   emb dtype
                   emb_hbm_ref,   # ANY  (rows,D) aliased to out_ref
                   out_ref,       # ANY  (rows,D)
                   sem):          # DMA semaphore
    del emb_hbm_ref  # same HBM buffer as out_ref; unmatched rows stay as-is.

    def body(r, carry):
        t = tok_ref[r]
        for p in range(num_placeholders):
            @pl.when(t == ph_tok_ref[p])
            def _():
                cp = pltpu.make_async_copy(
                    ph_emb_ref.at[pl.ds(p, 1), :],   # (1, D) VMEM
                    out_ref.at[pl.ds(r, 1), :],      # (1, D) HBM
                    sem)
                cp.start()
                cp.wait()
        return carry

    lax.fori_loop(0, rows, body, 0)


def _sparse_forward(tokenized_text, embedded_text, placeholder_tokens,
                    placeholder_embeddings, *, vmem_limit_bytes=None):
    b, n = tokenized_text.shape
    d = embedded_text.shape[-1]
    num_ph = placeholder_tokens.shape[0]
    rows = b * n
    dtype = embedded_text.dtype

    tok = tokenized_text.reshape(rows).astype(jnp.int32)
    emb2d = embedded_text.reshape(rows, d)
    # Note: placeholder embeddings are cast to the embedding dtype once here.
    ph_emb = placeholder_embeddings.astype(dtype)

    kernel = functools.partial(_sparse_kernel, num_ph, rows)

    out2d = pl.pallas_call(
        kernel,
        out_shape=jax.ShapeDtypeStruct((rows, d), dtype),
        grid_spec=pltpu.PrefetchScalarGridSpec(
            num_scalar_prefetch=2,          # placeholder ids + token ids -> SMEM
            grid=(1,),
            in_specs=[
                pl.BlockSpec((num_ph, d), lambda i, ph, tk: (0, 0)),  # table->VMEM
                pl.BlockSpec(memory_space=pl.ANY),                    # emb stays HBM
            ],
            out_specs=pl.BlockSpec(memory_space=pl.ANY),
            scratch_shapes=[pltpu.SemaphoreType.DMA(())],
        ),
        # inputs are (ph_tok, tok, ph_emb, emb2d) -> alias emb2d (index 3).
        input_output_aliases={3: 0},
        compiler_params=pltpu.CompilerParams(
            dimension_semantics=("arbitrary",),
            has_side_effects=True,
            vmem_limit_bytes=vmem_limit_bytes),
    )(placeholder_tokens.astype(jnp.int32), tok, ph_emb, emb2d)

    return out2d.reshape(b, n, d)


# ---------------------------------------------------------------------------
# Dense streaming path: one read + one write of the embedding tensor, no
# wrapper-side pad/slice, ragged last tile masked in-kernel.
# ---------------------------------------------------------------------------
def _dense_kernel(num_placeholders, rows, tm,
                  ph_tok_ref,   # SMEM (P,)    int32  (scalar prefetch)
                  tok_ref,      # VMEM (tm, 1) int32
                  ph_emb_ref,   # VMEM (P, D)  emb dtype
                  emb_ref,      # VMEM (tm, D) emb dtype
                  out_ref):     # VMEM (tm, D) emb dtype
    x = emb_ref[...]                      # native dtype, no f32 round-trip
    tok = tok_ref[...]                    # (tm, 1) int32

    if rows % tm != 0:
        # Ragged last tile: tokens read past `rows` are unspecified; make sure
        # they never inject a placeholder value (the OOB part of the output
        # block is clipped on write-back anyway).
        base = pl.program_id(0) * tm
        row_ids = base + lax.broadcasted_iota(jnp.int32, (tm, 1), 0)
        valid = row_ids < rows
    else:
        valid = None

    # P is a small static constant -> unrolled select chain on the VPU.
    for p in range(num_placeholders):
        mask = tok == ph_tok_ref[p]                    # (tm, 1)
        if valid is not None:
            mask = jnp.logical_and(mask, valid)
        x = jnp.where(mask, ph_emb_ref[p, :][None, :], x)
    out_ref[...] = x


def _dense_forward(tokenized_text, embedded_text, placeholder_tokens,
                   placeholder_embeddings, *,
                   target_block_bytes=2 * 1024 * 1024,
                   vmem_limit_bytes=None):
    b, n = tokenized_text.shape
    d = embedded_text.shape[-1]
    num_ph = placeholder_tokens.shape[0]
    rows = b * n
    dtype = embedded_text.dtype
    itemsize = jnp.dtype(dtype).itemsize

    tok2d = tokenized_text.reshape(rows, 1).astype(jnp.int32)
    emb2d = embedded_text.reshape(rows, d)
    ph_emb = placeholder_embeddings.astype(dtype)

    # Block sizing: ~target_block_bytes per streamed block (1-4 MiB sweet
    # spot), sublane-aligned, never larger than the (8-rounded) row count.
    # Live VMEM ~= 4 * block bytes (double-buffered in+out) which fits the
    # scoped defaults on v5e/v6e/v7x at the 2 MiB default; raise
    # vmem_limit_bytes / target_block_bytes together for bigger tiles.
    tm = max(8, (target_block_bytes // (d * itemsize)) // 8 * 8)
    tm = min(tm, max(8, ((rows + 7) // 8) * 8))
    grid = (pl.cdiv(rows, tm),)

    kernel = functools.partial(_dense_kernel, num_ph, rows, tm)
    cost = pl.CostEstimate(
        flops=rows * d * num_ph,
        transcendentals=0,
        bytes_accessed=2 * rows * d * itemsize + rows * 4 + num_ph * d * itemsize)

    out2d = pl.pallas_call(
        kernel,
        out_shape=jax.ShapeDtypeStruct((rows, d), dtype),
        grid_spec=pltpu.PrefetchScalarGridSpec(
            num_scalar_prefetch=1,          # placeholder token ids -> SMEM
            grid=grid,
            in_specs=[
                pl.BlockSpec((tm, 1), lambda i, ph: (i, 0)),       # tokens
                pl.BlockSpec((num_ph, d), lambda i, ph: (0, 0)),   # ph table
                pl.BlockSpec((tm, d), lambda i, ph: (i, 0)),       # embeddings
            ],
            out_specs=pl.BlockSpec((tm, d), lambda i, ph: (i, 0)),
        ),
        # inputs are (ph_tok, tok2d, ph_emb, emb2d) -> alias emb2d (index 3),
        # so no second rows*D HBM buffer is allocated.
        input_output_aliases={3: 0},
        cost_estimate=cost,
        compiler_params=pltpu.CompilerParams(
            dimension_semantics=("parallel",),
            vmem_limit_bytes=vmem_limit_bytes),
    )(placeholder_tokens.astype(jnp.int32), tok2d, ph_emb, emb2d)

    return out2d.reshape(b, n, d)


def embedding_manager_forward(tokenized_text, embedded_text,
                              placeholder_tokens, placeholder_embeddings,
                              *, mode="sparse", **kwargs):
    """tokenized_text (B, N) int, embedded_text (B, N, D),
    placeholder_tokens (P,) int, placeholder_embeddings (P, D).

    In production wrap the call in jax.jit with embedded_text donated so the
    input/output alias is genuinely in-place (no defensive copy)."""
    if mode == "sparse":
        return _sparse_forward(tokenized_text, embedded_text,
                               placeholder_tokens, placeholder_embeddings,
                               **kwargs)
    return _dense_forward(tokenized_text, embedded_text,
                          placeholder_tokens, placeholder_embeddings, **kwargs)


if __name__ == "__main__":
    D = 128                      # lane-dense demo dim (real 768/1280 are too)
    NUM_VECTORS_PER_TOKEN = 1    # module default

    key = jax.random.PRNGKey(0)
    k_tok, k_emb, k_p0, k_p1 = jax.random.split(key, 4)

    # Two placeholder strings -> two distinct placeholder token ids and their
    # learned embeddings (mirrors torch.rand(num_vectors_per_token, token_dim)).
    placeholder_tokens = jnp.array([31337, 424], dtype=jnp.int32)
    P = placeholder_tokens.shape[0]
    placeholder_embeddings = jnp.concatenate([
        jax.random.uniform(k_p0, (NUM_VECTORS_PER_TOKEN, D), jnp.float32),
        jax.random.uniform(k_p1, (NUM_VECTORS_PER_TOKEN, D), jnp.float32),
    ], axis=0)  # (P, D)

    def reference(tok, emb):
        ref = emb
        for p in range(P):
            m = (tok == placeholder_tokens[p])[..., None]
            ref = jnp.where(m, placeholder_embeddings[p][None, None, :], ref)
        return ref

    def run_case(B, N, **dense_kwargs):
        kt, ke = jax.random.split(jax.random.fold_in(key, B * 1000 + N), 2)
        tok = jax.random.randint(kt, (B, N), 0, 30000, jnp.int32)
        tok = tok.at[0, 2].set(31337)
        tok = tok.at[1, N - 3].set(424)
        tok = tok.at[1, 1].set(31337)
        emb = jax.random.normal(ke, (B, N, D), jnp.float32)
        ref = reference(tok, emb)

        out_sparse = jax.block_until_ready(embedding_manager_forward(
            tok, emb, placeholder_tokens, placeholder_embeddings, mode="sparse"))
        assert out_sparse.shape == ref.shape
        assert jnp.allclose(out_sparse, ref, atol=1e-6), "sparse mismatch"

        out_dense = jax.block_until_ready(embedding_manager_forward(
            tok, emb, placeholder_tokens, placeholder_embeddings, mode="dense",
            **dense_kwargs))
        assert out_dense.shape == ref.shape
        assert jnp.allclose(out_dense, ref, atol=1e-6), "dense mismatch"

    # Case 1: rows (=16) divide the block exactly, single-block grid.
    run_case(2, 8)
    # Case 2: force tm=8 over rows=18 -> multi-step grid with a ragged last
    # tile (exercises the no-pad path; real CLIP prompts with N=77 are ragged).
    run_case(2, 9, target_block_bytes=8 * D * 4)

    print("KERNEL_OK")
</pallas_src>

<mosaic_0001>
module attributes {stable_mosaic.version = 11 : i64} {
  func.func @_sparse_kernel(%arg0: i32, %arg1: memref<2xi32, #tpu.memory_space<smem>>, %arg2: memref<16xi32, #tpu.memory_space<smem>>, %arg3: memref<2x128xf32, #tpu.memory_space<vmem>>, %arg4: memref<16x128xf32, #tpu.memory_space<any>>, %arg5: memref<16x128xf32, #tpu.memory_space<any>>, %arg6: memref<!tpu.dma_semaphore, #tpu.memory_space<semaphore_mem>>) attributes {dimension_semantics = [#tpu.dimension_semantics<arbitrary>], iteration_bounds = array<i64: 1>, scalar_prefetch = 2 : i64, scratch_operands = 1 : i64, tpu.core_type = #tpu.core_type<tc>, window_params = [{pipeline_mode = #tpu.pipeline_mode<synchronous>, transform_indices = @transform_0, window_bounds = array<i64: 2, 128>}, {}, {}]} {
    %c0_i32 = arith.constant 0 : i32
    %c16_i32 = arith.constant 16 : i32
    %0 = arith.addi %c0_i32, %c16_i32 : i32
    %c1_i32 = arith.constant 1 : i32
    scf.for %arg7 = %c0_i32 to %0 step %c1_i32  : i32 {
      %1 = arith.index_cast %arg7 : i32 to index
      %2 = memref.load %arg2[%1] : memref<16xi32, #tpu.memory_space<smem>>
      %c0 = arith.constant 0 : index
      %3 = memref.load %arg1[%c0] : memref<2xi32, #tpu.memory_space<smem>>
      %4 = arith.cmpi eq, %2, %3 : i32
      %5 = arith.extui %4 : i1 to i32
      %c0_i32_1 = arith.constant 0 : i32
      %6 = arith.cmpi ne, %5, %c0_i32_1 : i32
      scf.if %6 {
        %c0_i32_3 = arith.constant 0 : i32
        %c0_i32_4 = arith.constant 0 : i32
        %11 = tpu.memref_slice %arg3[%c0_i32_3, %c0_i32_4] : memref<2x128xf32, #tpu.memory_space<vmem>> -> memref<1x128xf32, #tpu.memory_space<vmem>>
        %c0_i32_5 = arith.constant 0 : i32
        %12 = tpu.memref_slice %arg5[%arg7, %c0_i32_5] : memref<16x128xf32, #tpu.memory_space<any>> -> memref<1x128xf32, #tpu.memory_space<any>>
        tpu.enqueue_dma source(%11 : memref<1x128xf32, #tpu.memory_space<vmem>>) target(%12 : memref<1x128xf32, #tpu.memory_space<any>>) target_semaphore(%arg6 : memref<!tpu.dma_semaphore, #tpu.memory_space<semaphore_mem>>)
        %c0_i32_6 = arith.constant 0 : i32
        %c0_i32_7 = arith.constant 0 : i32
        %13 = tpu.memref_slice %arg3[%c0_i32_6, %c0_i32_7] : memref<2x128xf32, #tpu.memory_space<vmem>> -> memref<1x128xf32, #tpu.memory_space<vmem>>
        %c0_i32_8 = arith.constant 0 : i32
        %14 = tpu.memref_slice %arg5[%arg7, %c0_i32_8] : memref<16x128xf32, #tpu.memory_space<any>> -> memref<1x128xf32, #tpu.memory_space<any>>
        tpu.wait_dma2 semaphore(%arg6 : memref<!tpu.dma_semaphore, #tpu.memory_space<semaphore_mem>>) src(%13 : memref<1x128xf32, #tpu.memory_space<vmem>>) dst(%14 : memref<1x128xf32, #tpu.memory_space<any>>)
      } else {
      }
      %c1 = arith.constant 1 : index
      %7 = memref.load %arg1[%c1] : memref<2xi32, #tpu.memory_space<smem>>
      %8 = arith.cmpi eq, %2, %7 : i32
      %9 = arith.extui %8 : i1 to i32
      %c0_i32_2 = arith.constant 0 : i32
      %10 = arith.cmpi ne, %9, %c0_i32_2 : i32
      scf.if %10 {
        %c1_i32_3 = arith.constant 1 : i32
        %c0_i32_4 = arith.constant 0 : i32
        %11 = tpu.memref_slice %arg3[%c1_i32_3, %c0_i32_4] : memref<2x128xf32, #tpu.memory_space<vmem>> -> memref<1x128xf32, #tpu.memory_space<vmem>>
        %c0_i32_5 = arith.constant 0 : i32
        %12 = tpu.memref_slice %arg5[%arg7, %c0_i32_5] : memref<16x128xf32, #tpu.memory_space<any>> -> memref<1x128xf32, #tpu.memory_space<any>>
        tpu.enqueue_dma source(%11 : memref<1x128xf32, #tpu.memory_space<vmem>>) target(%12 : memref<1x128xf32, #tpu.memory_space<any>>) target_semaphore(%arg6 : memref<!tpu.dma_semaphore, #tpu.memory_space<semaphore_mem>>)
        %c1_i32_6 = arith.constant 1 : i32
        %c0_i32_7 = arith.constant 0 : i32
        %13 = tpu.memref_slice %arg3[%c1_i32_6, %c0_i32_7] : memref<2x128xf32, #tpu.memory_space<vmem>> -> memref<1x128xf32, #tpu.memory_space<vmem>>
        %c0_i32_8 = arith.constant 0 : i32
        %14 = tpu.memref_slice %arg5[%arg7, %c0_i32_8] : memref<16x128xf32, #tpu.memory_space<any>> -> memref<1x128xf32, #tpu.memory_space<any>>
        tpu.wait_dma2 semaphore(%arg6 : memref<!tpu.dma_semaphore, #tpu.memory_space<semaphore_mem>>) src(%13 : memref<1x128xf32, #tpu.memory_space<vmem>>) dst(%14 : memref<1x128xf32, #tpu.memory_space<any>>)
      } else {
      }
    }
    %c16_i32_0 = arith.constant 16 : i32
    return
  }
  func.func @transform_0(%arg0: i32, %arg1: memref<2xi32, #tpu.memory_space<smem>>, %arg2: memref<16xi32, #tpu.memory_space<smem>>) -> (i32, i32) {
    %c0_i32 = arith.constant 0 : i32
    %c0_i32_0 = arith.constant 0 : i32
    %c0_i32_1 = arith.constant 0 : i32
    return %c0_i32, %c0_i32_0 : i32, i32
  }
}

</mosaic_0001>

<bundles_post_ra>
// kernel: tpu_custom_call.1
= control target key start
LH: loop header
LB: loop body
LE: loop exit
PB: predicated region body
PF: predicated region fallthrough
CT: control target
= control target key end

     0   :  { %s330_s0 = inlined_call_operand.vmem [shape: s32[2], index: 0, kind: input, shape index: {}]   ;;  %s331_s2 = inlined_call_operand.vmem [shape: f32[2,128], index: 2, kind: input, shape index: {}]   ;;  %s332_s3 = inlined_call_operand.hbm [shape: f32[16,128], index: 3, kind: input, shape index: {}, may-alias: {3,4}]   ;;  %s333_s4 = inlined_call_operand.hbm [shape: f32[16,128], index: 4, kind: output, shape index: {}, may-alias: {3,4}]   ;;  %s334_s1 = inlined_call_operand.vmem [shape: s32[16], index: 1, kind: input, shape index: {}]  }
   0x1   :  { %s9_s17 = sshll.u32 %s330_s0, 4  ;;  %s13_s20 = sshll.u32 %s334_s1, 4  ;;  %s10_s17 = int_to_ptr.vmem [resolvable:$true] %s9_s17  ;;  %s14_s20 = int_to_ptr.vmem [resolvable:$true] %s13_s20 }
   0x2   :  { %s110_s21 = scalar_lea.vmem %s10_s17, 16  ;;  %p115_p1 = scmp.lt.s32.totalorder %s10_s17, %s10_s17 }
   0x3   :  { %p111_p0 = scmp.ne.s32.totalorder %s10_s17, %s110_s21  ;;  %p116_p2 = scmp.lt.s32.totalorder %s110_s21, %s110_s21 }
   0x5   :  { %p117_p3 = por %p116_p2, %p115_p1 }
   0x7   :  { %p118_p4 = pnand %p117_p3, %p111_p0 }
   0x9   :  { %121 = shalt.err (!%p118_p4)  }
   0xa   :  { %s204_s3 = smov [#allocation4]   ;;  %s122_s22 = scalar_lea.vmem %s14_s20, 16 }
   0xb   :  { %12 = dma.vmem_to_smem %s10_s17, 16, %s204_s3, [#allocation3] }
   0xc   :  { %p123_p5 = scmp.ne.s32.totalorder %s14_s20, %s122_s22  ;;  %p127_p6 = scmp.lt.s32.totalorder %s14_s20, %s14_s20 }
   0xd   :  { %p128_p7 = scmp.lt.s32.totalorder %s122_s22, %s122_s22 }
   0xf   :  { %p129_p8 = por %p128_p7, %p127_p6 }
  0x11   :  { %p130_p9 = pnand %p129_p8, %p123_p5 }
  0x13   :  { %133 = shalt.err (!%p130_p9)  }
  0x14   :  { %s205_s0 = smov [#allocation5]  }
  0x15   :  { %16 = dma.vmem_to_smem %s14_s20, 16, %s205_s0, [#allocation3] }
  0x16   :  { %190 = dma.done.wait [#allocation3], 32 }
  0x17   :  { %191 = vsyncadd [#allocation3], 4294967264 }
  0x18   :  { %18 = sfence }
  0x19   :  { %s237_s1 = smov 0  }
  0x1a LB: > { %s28_s23 = sld [smem:[#allocation4]]  ;;  %s87_s25 = sshll.u32 %s202_s1, 4  ;;  %s202_s1 = sphi %s237_s1, %s26_s1  }
  0x1b   : > { %s243_s24 = sld [smem:[#allocation5 + %s202_s1]]  ;;  %s42_s28 = sshll.u32 %s331_s2, 4  ;;  %s254_s28 = int_to_ptr.vmem [resolvable:$true] %s42_s28 }
  0x1c   : > { %s252_s5 = scalar_lea.hbm %s333_s4, %s87_s25  ;;  %s134_s7 = scalar_lea.vmem %s254_s28, 16 }
  0x1d   : > { %p135_p11 = scmp.ne.s32.totalorder %s254_s28, %s134_s7  ;;  %s140_s8 = scalar_lea.vmem %s254_s28, 32 }
  0x1e   : > { %p141_p0 = scmp.lt.s32.totalorder %s254_s28, %s254_s28  ;;  %p142_p1 = scmp.lt.s32.totalorder %s140_s8, %s134_s7 }
  0x20   : > { %p143_p2 = por %p142_p1, %p141_p0 }
  0x21   : > { %p257_p10 = scmp.eq.s32.totalorder %s243_s24, %s28_s23 }
  0x23   : > { %p136_p12 = pnand %p135_p11, %p257_p10 }
  0x25   : > { %p137_p13 = pneg %p136_p12 }
  0x27   : > { %p144_p3 = pnand %p143_p2, %p137_p13 }
  0x29   : > { %147 = shalt.err (!%p144_p3)  }
  0x2a   : > { %s148_s9 = scalar_lea.hbm %s252_s5, 16  ;;  %s152_s13 = scalar_lea.hbm %s333_s4, 256 }
  0x2b   : > { %p272_p4 = scmp.ne.s32.totalorder %s252_s5, %s148_s9  ;;  %p153_p7 = scmp.lt.s32.totalorder %s252_s5, %s333_s4 }
  0x2c   : > { %p154_p8 = scmp.lt.s32.totalorder %s152_s13, %s148_s9 }
  0x2d   : > { %p150_p5 = pnand %p272_p4, %p257_p10 }
  0x2e   : > { %p287_p9 = por %p154_p8, %p153_p7 }
  0x2f   : > { %p151_p6 = pneg %p150_p5 }
  0x31   : > { %p156_p11 = pnand %p287_p9, %p151_p6 }
  0x33   : > { %159 = shalt.err (!%p156_p11)  }
  0x34   : > { %93 = dma.vmem_to_hbm [thread:$0]  (%p257_p10), %s254_s28, 16, %s252_s5, [#allocation2] }
  0x35   : > { %193 = dma.done.wait (%p257_p10), [#allocation2], 16 }
  0x36   : > { %195 = vsyncadd (%p257_p10), [#allocation2], 4294967280  ;;  %s54_s19 = scalar_lea.vmem %s331_s2, 1  ;;  %s88_s20 = sld [smem:[#allocation4 + $0x1]] }
  0x37   : > { %s64_s21 = sshll.u32 %s54_s19, 4  ;;  %s65_s21 = int_to_ptr.vmem [resolvable:$true] %s64_s21 }
  0x38   : > { %s160_s22 = scalar_lea.vmem %s65_s21, 16  ;;  %p167_p1 = scmp.lt.s32.totalorder %s65_s21, %s254_s28 }
  0x39   : > { %p161_p13 = scmp.ne.s32.totalorder %s65_s21, %s160_s22  ;;  %p168_p2 = scmp.lt.s32.totalorder %s140_s8, %s160_s22 }
  0x3b   : > { %p169_p3 = por %p168_p2, %p167_p1 }
  0x3c   : > { %p305_p12 = scmp.eq.s32.totalorder %s243_s24, %s88_s20 }
  0x3e   : > { %p162_p0 = pnand %p161_p13, %p305_p12 }
  0x40   : > { %p163_p10 = pneg %p162_p0 }
  0x42   : > { %p170_p5 = pnand %p169_p3, %p163_p10 }
  0x44   : > { %173 = shalt.err (!%p170_p5)  }
  0x45   : > { %p176_p6 = pnand %p272_p4, %p305_p12 }
  0x47   : > { %p177_p7 = pneg %p176_p6 }
  0x49   : > { %p182_p8 = pnand %p177_p7, %p287_p9 }
  0x4b   : > { %185 = shalt.err (!%p182_p8)  }
  0x4c   : > { %96 = dma.vmem_to_hbm [thread:$0]  (%p305_p12), %s65_s21, 16, %s252_s5, [#allocation2] }
  0x4d   : > { %197 = dma.done.wait (%p305_p12), [#allocation2], 16 }
  0x4e   : > { %199 = vsyncadd (%p305_p12), [#allocation2], 4294967280  ;;  %s26_s1 = sadd.s32 1, %s202_s1  }
  0x4f   : > { %p23_p11 = scmp.ge.s32.totalorder %s26_s1, 16  }
  0x51   :  { %25 = sbr.rel (!%p23_p11) target bundleno = 26 (0x1a), region = 42 }
  0x56   :  { %71 = vsyncmov [#allocation2] }
  0x59   :  { %s72_s0 = vpop.sfrf %71 }
  0x5a   :  { %p91_p4 = scmp.ne.s32.totalorder %s72_s0, 0 }
  0x5c   :  { %76 = shalt.err (%p91_p4)  }

</bundles_post_ra>
